<compile_context>
chip_gen: v6e
topology: v6e:2x2x1
jax: 0.10.0
libtpu: 0.0.40
codegen_flags: <defaults>
</compile_context>

<pallas_src>
import functools
import math

import jax
import jax.numpy as jnp
from jax.experimental import pallas as pl
from jax.experimental.pallas import tpu as pltpu


MXU_DTYPE = jnp.bfloat16   # matmul-input dtype (f32 accumulate). Set to jnp.float32 for bit-faithful numerics.
ROW_TILE = 512             # preferred rows-per-tile for the im2col matmuls
BATCH_TILE = 32            # preferred batches-per-tile for the fused BN/linear kernel


def _round_up(x, m):
    return (x + m - 1) // m * m


def _pick_row_tile(m, preferred=ROW_TILE):
    m8 = _round_up(m, 8)
    return m8 if m8 <= preferred else preferred


# ----------------------------------------------------------------------------
# Pallas kernels
# ----------------------------------------------------------------------------

def _conv1_kernel(p_ref, w_ref, b_ref, o_ref):
    # (tm, K) @ (K, 64) + bias, fused LeakyReLU(0.2). f32 accumulate/output.
    y = jnp.dot(p_ref[...], w_ref[...], preferred_element_type=jnp.float32)
    y = y + b_ref[...]
    o_ref[...] = jnp.where(y > 0, y, 0.2 * y)


def _conv2_pass1_kernel(p_ref, w_ref, b_ref, y_ref, stats_ref, *, m_valid):
    # Pass 1 of conv2: (tm, 1024) @ (1024, 128) + bias. Also emits per-tile
    # per-channel sum / sum-of-squares (rows beyond m_valid are masked so
    # zero-padded rows never pollute the BatchNorm statistics).
    i = pl.program_id(0)
    tm = p_ref.shape[0]
    y = jnp.dot(p_ref[...], w_ref[...], preferred_element_type=jnp.float32)
    y = y + b_ref[...]
    y_ref[...] = y

    row = jax.lax.broadcasted_iota(jnp.int32, (tm, 1), 0) + i * tm
    ym = jnp.where(row < m_valid, y, 0.0)
    s = jnp.sum(ym, axis=0, keepdims=True)          # (1, 128)
    sq = jnp.sum(ym * ym, axis=0, keepdims=True)    # (1, 128)
    pad = jnp.zeros((6, s.shape[1]), jnp.float32)
    stats_ref[...] = jnp.concatenate([s, sq, pad], axis=0)[None]   # (1, 8, 128)


def _bn_lrelu_linear_sigmoid_kernel(y_ref, scale_ref, shift_ref, w_ref, b_ref, o_ref):
    # Pass 2: apply BN (precomputed scale/shift), LeakyReLU(0.2), then the
    # final Linear as a VPU/XLU multiply-reduce (weight already permuted to
    # NHWC-flat order), then exact sigmoid. All f32.
    y = y_ref[...]                                   # (tb, 49, 128)
    yn = y * scale_ref[...] + shift_ref[...]         # broadcast (1,1,128)
    lr = jnp.where(yn > 0, yn, 0.2 * yn)
    prod = lr * w_ref[...]                           # (1,49,128) broadcast
    s = jnp.sum(prod, axis=1)                        # (tb, 128)
    s = jnp.sum(s, axis=1, keepdims=True)            # (tb, 1)
    z = s + b_ref[...]                               # (1,1) broadcast
    o_ref[...] = 1.0 / (1.0 + jnp.exp(-z))           # exact sigmoid (keeps numerics faithful)


# ----------------------------------------------------------------------------
# Tiled pallas_call wrappers
# ----------------------------------------------------------------------------

def _conv1_matmul(p1, w1, b1):
    M, K = p1.shape
    N = w1.shape[1]
    tm = _pick_row_tile(M)
    Mp = _round_up(M, tm)
    if Mp != M:
        p1 = jnp.pad(p1, ((0, Mp - M), (0, 0)))
    n_tiles = Mp // tm
    mxu_bytes = jnp.dtype(MXU_DTYPE).itemsize
    out = pl.pallas_call(
        _conv1_kernel,
        out_shape=jax.ShapeDtypeStruct((Mp, N), jnp.float32),
        grid=(n_tiles,),
        in_specs=[pl.BlockSpec((tm, K), lambda i: (i, 0)),
                  pl.BlockSpec((K, N), lambda i: (0, 0)),
                  pl.BlockSpec((1, N), lambda i: (0, 0))],
        out_specs=pl.BlockSpec((tm, N), lambda i: (i, 0)),
        compiler_params=pltpu.CompilerParams(dimension_semantics=("parallel",)),
        cost_estimate=pl.CostEstimate(
            flops=2 * Mp * K * N,
            transcendentals=0,
            bytes_accessed=(Mp * K + K * N) * mxu_bytes + (N + Mp * N) * 4),
    )(p1.astype(MXU_DTYPE), w1.astype(MXU_DTYPE), b1.reshape(1, N).astype(jnp.float32))
    return out[:M]


def _conv2_matmul_with_stats(p2, w2, b2):
    M, K = p2.shape
    N = w2.shape[1]
    tm = _pick_row_tile(M)
    Mp = _round_up(M, tm)
    if Mp != M:
        p2 = jnp.pad(p2, ((0, Mp - M), (0, 0)))
    n_tiles = Mp // tm
    mxu_bytes = jnp.dtype(MXU_DTYPE).itemsize
    kern = functools.partial(_conv2_pass1_kernel, m_valid=M)
    y, stats = pl.pallas_call(
        kern,
        out_shape=(jax.ShapeDtypeStruct((Mp, N), jnp.float32),
                   jax.ShapeDtypeStruct((n_tiles, 8, N), jnp.float32)),
        grid=(n_tiles,),
        in_specs=[pl.BlockSpec((tm, K), lambda i: (i, 0)),
                  pl.BlockSpec((K, N), lambda i: (0, 0)),
                  pl.BlockSpec((1, N), lambda i: (0, 0))],
        out_specs=(pl.BlockSpec((tm, N), lambda i: (i, 0)),
                   pl.BlockSpec((1, 8, N), lambda i: (i, 0, 0))),
        compiler_params=pltpu.CompilerParams(dimension_semantics=("parallel",)),
        cost_estimate=pl.CostEstimate(
            flops=2 * Mp * K * N,
            transcendentals=0,
            bytes_accessed=(Mp * K + K * N) * mxu_bytes
                           + (N + Mp * N + n_tiles * 8 * N) * 4),
    )(p2.astype(MXU_DTYPE), w2.astype(MXU_DTYPE), b2.reshape(1, N).astype(jnp.float32))
    sums = jnp.sum(stats[:, 0, :], axis=0)       # (128,)
    sumsqs = jnp.sum(stats[:, 1, :], axis=0)     # (128,)
    return y[:M], sums, sumsqs


def _bn_flatten_linear_sigmoid(y2r, scale, shift, w_lin, b_lin):
    B, HW, C = y2r.shape
    tb = min(BATCH_TILE, _round_up(B, 8))
    Bp = _round_up(B, tb)
    if Bp != B:
        y2r = jnp.pad(y2r, ((0, Bp - B), (0, 0), (0, 0)))
    n_tiles = Bp // tb
    out = pl.pallas_call(
        _bn_lrelu_linear_sigmoid_kernel,
        out_shape=jax.ShapeDtypeStruct((Bp, 1), jnp.float32),
        grid=(n_tiles,),
        in_specs=[pl.BlockSpec((tb, HW, C), lambda i: (i, 0, 0)),
                  pl.BlockSpec((1, 1, C), lambda i: (0, 0, 0)),
                  pl.BlockSpec((1, 1, C), lambda i: (0, 0, 0)),
                  pl.BlockSpec((1, HW, C), lambda i: (0, 0, 0)),
                  pl.BlockSpec((1, 1), lambda i: (0, 0))],
        out_specs=pl.BlockSpec((tb, 1), lambda i: (i, 0)),
        compiler_params=pltpu.CompilerParams(dimension_semantics=("parallel",)),
        cost_estimate=pl.CostEstimate(
            flops=6 * Bp * HW * C,
            transcendentals=Bp,
            bytes_accessed=(Bp * HW * C + 2 * C + HW * C + 1 + Bp) * 4),
    )(y2r.astype(jnp.float32),
      scale.reshape(1, 1, C).astype(jnp.float32),
      shift.reshape(1, 1, C).astype(jnp.float32),
      w_lin.reshape(1, HW, C).astype(jnp.float32),
      b_lin.reshape(1, 1).astype(jnp.float32))
    return out[:B]


# ----------------------------------------------------------------------------
# Glue: im2col patch extraction (pure data movement, stays in plain JAX)
# ----------------------------------------------------------------------------

def _im2col(x_nhwc, kh, kw, stride, pad):
    """x: (B, H, W, C) -> patches (B*Ho*Wo, kh*kw*C), ordered (kh, kw, c)."""
    b, h, w, c = x_nhwc.shape
    ho = (h + 2 * pad - kh) // stride + 1
    wo = (w + 2 * pad - kw) // stride + 1
    xp = jnp.pad(x_nhwc, ((0, 0), (pad, pad), (pad, pad), (0, 0)))
    cols = []
    for i in range(kh):
        for j in range(kw):
            cols.append(xp[:, i:i + stride * ho:stride, j:j + stride * wo:stride, :])
    patches = jnp.stack(cols, axis=3)                      # (B, Ho, Wo, kh*kw, C)
    patches = patches.reshape(b * ho * wo, kh * kw * c)    # (M, K)
    return patches, ho, wo


# ----------------------------------------------------------------------------
# Parameter init (deterministic, PyTorch-like fan-in uniform / defaults)
# ----------------------------------------------------------------------------

def init_params(key):
    ks = jax.random.split(key, 8)

    def uniform(k, shape, bound):
        return jax.random.uniform(k, shape, jnp.float32, -bound, bound)

    # Embedding(10, 784): default N(0, 1)
    emb_w = jax.random.normal(ks[0], (10, 28 * 28), jnp.float32)

    # Conv2d(2, 64, 4): weight (out, in, kh, kw), fan_in = 2*4*4
    b1 = 1.0 / math.sqrt(2 * 4 * 4)
    conv1_w = uniform(ks[1], (64, 2, 4, 4), b1)
    conv1_b = uniform(ks[2], (64,), b1)

    # Conv2d(64, 128, 4): fan_in = 64*4*4
    b2 = 1.0 / math.sqrt(64 * 4 * 4)
    conv2_w = uniform(ks[3], (128, 64, 4, 4), b2)
    conv2_b = uniform(ks[4], (128,), b2)

    # BatchNorm2d(128): weight=1, bias=0
    bn_g = jnp.ones((128,), jnp.float32)
    bn_b = jnp.zeros((128,), jnp.float32)

    # Linear(6272, 1): fan_in = 6272
    b3 = 1.0 / math.sqrt(128 * 7 * 7)
    lin_w = uniform(ks[5], (1, 128 * 7 * 7), b3)   # PyTorch layout (out, in)
    lin_b = uniform(ks[6], (1,), b3)

    return dict(emb_w=emb_w, conv1_w=conv1_w, conv1_b=conv1_b,
                conv2_w=conv2_w, conv2_b=conv2_b, bn_g=bn_g, bn_b=bn_b,
                lin_w=lin_w, lin_b=lin_b)


# ----------------------------------------------------------------------------
# Forward
# ----------------------------------------------------------------------------

def discriminator_forward(params, x_nchw, labels):
    B = x_nchw.shape[0]

    # Embedding lookup (gather) + reshape to a label image.
    label_img = params["emb_w"][labels].reshape(B, 1, 28, 28)          # NCHW
    x = jnp.concatenate([x_nchw, label_img], axis=1)                   # (B,2,28,28)
    x = jnp.transpose(x, (0, 2, 3, 1))                                 # -> NHWC (B,28,28,2)

    # ----- Conv1 (2 -> 64, k4 s2 p1) + LeakyReLU, tiled over rows -----
    p1, ho1, wo1 = _im2col(x, 4, 4, 2, 1)                              # (B*196, 32)
    w1 = jnp.transpose(params["conv1_w"], (2, 3, 1, 0)).reshape(2 * 16, 64)  # (kh,kw,in,out)->(K,64)
    y1 = _conv1_matmul(p1, w1, params["conv1_b"])                      # (B*196, 64)
    y1 = y1.reshape(B, ho1, wo1, 64)                                   # NHWC (B,14,14,64)

    # ----- Conv2 (64 -> 128): pass 1 = tiled matmul + bias + BN partial stats -----
    # TODO(synk): fuse this im2col into the conv2 kernel (sliding-window reads of y1) to cut HBM traffic further.
    p2, ho2, wo2 = _im2col(y1, 4, 4, 2, 1)                             # (B*49, 1024)
    w2 = jnp.transpose(params["conv2_w"], (2, 3, 1, 0)).reshape(64 * 16, 128)
    M2 = B * ho2 * wo2
    y2, sums, sumsqs = _conv2_matmul_with_stats(p2, w2, params["conv2_b"])

    # BatchNorm batch statistics (train-mode: biased variance, eps=1e-5).
    # Tiny 128-vector glue math in plain JAX between the two kernel passes.
    mean = sums / M2
    var = jnp.maximum(sumsqs / M2 - mean * mean, 0.0)
    inv = jax.lax.rsqrt(var + 1e-5)
    scale = params["bn_g"] * inv
    shift = params["bn_b"] - mean * scale

    # ----- Pass 2: BN-apply + LeakyReLU + Flatten + Linear + Sigmoid (fused) -----
    # No activation transpose: the Linear weight is permuted once from
    # NCHW-flat order (PyTorch Flatten) to our NHWC-flat row order.
    y2r = y2.reshape(B, ho2 * wo2, 128)                                # NHWC-flat (B,49,128)
    w_lin = params["lin_w"].reshape(128, ho2, wo2)
    w_lin = jnp.transpose(w_lin, (1, 2, 0)).reshape(ho2 * wo2, 128)    # (49,128), NHWC order
    out = _bn_flatten_linear_sigmoid(y2r, scale, shift, w_lin, params["lin_b"])
    return out                                                          # (B, 1)


# ----------------------------------------------------------------------------
# Main
# ----------------------------------------------------------------------------

if __name__ == "__main__":
    key = jax.random.PRNGKey(0)
    k_param, k_x, k_lbl = jax.random.split(key, 3)

    params = init_params(k_param)

    B = 2
    x = jax.random.normal(k_x, (B, 1, 28, 28), jnp.float32)   # NCHW, like PyTorch input
    labels = jax.random.randint(k_lbl, (B,), 0, 10, jnp.int32)

    out = discriminator_forward(params, x, labels)
    out = jax.block_until_ready(out)

    assert out.shape == (B, 1)
    assert bool(jnp.all((out >= 0.0) & (out <= 1.0)))
    print("KERNEL_OK")
</pallas_src>

<mosaic_0001>
module attributes {stable_mosaic.version = 11 : i64} {
  func.func @_conv1_kernel(%arg0: i32, %arg1: memref<392x32xbf16, #tpu.memory_space<vmem>>, %arg2: memref<32x64xbf16, #tpu.memory_space<vmem>>, %arg3: memref<1x64xf32, #tpu.memory_space<vmem>>, %arg4: memref<392x64xf32, #tpu.memory_space<vmem>>) attributes {dimension_semantics = [#tpu.dimension_semantics<parallel>], iteration_bounds = array<i64: 1>, scalar_prefetch = 0 : i64, scratch_operands = 0 : i64, tpu.core_type = #tpu.core_type<tc>, window_params = [{transform_indices = @transform_0, window_bounds = array<i64: 392, 32>}, {pipeline_mode = #tpu.pipeline_mode<synchronous>, transform_indices = @transform_1, window_bounds = array<i64: 32, 64>}, {pipeline_mode = #tpu.pipeline_mode<synchronous>, transform_indices = @transform_2, window_bounds = array<i64: 1, 64>}, {transform_indices = @transform_3, window_bounds = array<i64: 392, 64>}]} {
    %c0 = arith.constant 0 : index
    %c0_0 = arith.constant 0 : index
    %0 = vector.load %arg1[%c0, %c0_0] : memref<392x32xbf16, #tpu.memory_space<vmem>>, vector<392x32xbf16>
    %c0_1 = arith.constant 0 : index
    %c0_2 = arith.constant 0 : index
    %1 = vector.load %arg2[%c0_1, %c0_2] : memref<32x64xbf16, #tpu.memory_space<vmem>>, vector<32x64xbf16>
    %cst = arith.constant dense<0.000000e+00> : vector<392x64xf32>
    %2 = tpu.matmul %0, %1, %cst {dimension_numbers = #tpu.dot_dimension_numbers<[1], [0], [0], [1], [0, 0, 1, 1], [], []>} : vector<392x32xbf16>, vector<32x64xbf16>, vector<392x64xf32> -> vector<392x64xf32>
    %c0_3 = arith.constant 0 : index
    %c0_4 = arith.constant 0 : index
    %3 = vector.load %arg3[%c0_3, %c0_4] : memref<1x64xf32, #tpu.memory_space<vmem>>, vector<1x64xf32>
    %4 = vector.broadcast %3 : vector<1x64xf32> to vector<392x64xf32>
    %5 = arith.addf %2, %4 : vector<392x64xf32>
    %cst_5 = arith.constant 0.000000e+00 : f32
    %6 = vector.broadcast %cst_5 : f32 to vector<392x64xf32>
    %7 = arith.cmpf ogt, %5, %6 : vector<392x64xf32>
    %cst_6 = arith.constant 2.000000e-01 : f32
    %8 = vector.broadcast %cst_6 : f32 to vector<392x64xf32>
    %9 = arith.mulf %8, %5 : vector<392x64xf32>
    %10 = arith.select %7, %5, %9 : vector<392x64xi1>, vector<392x64xf32>
    %c0_7 = arith.constant 0 : index
    %c0_8 = arith.constant 0 : index
    %11 = vector.load %arg4[%c0_7, %c0_8] : memref<392x64xf32, #tpu.memory_space<vmem>>, vector<392x64xf32>
    tpu.vector_store %arg4[%c0_7, %c0_8], %10 {strides = array<i32>} : memref<392x64xf32, #tpu.memory_space<vmem>>, vector<392x64xf32>,
    return
  }
  func.func @transform_0(%arg0: i32) -> (i32, i32) {
    %c0_i32 = arith.constant 0 : i32
    %c0_i32_0 = arith.constant 0 : i32
    return %arg0, %c0_i32 : i32, i32
  }
  func.func @transform_1(%arg0: i32) -> (i32, i32) {
    %c0_i32 = arith.constant 0 : i32
    %c0_i32_0 = arith.constant 0 : i32
    %c0_i32_1 = arith.constant 0 : i32
    return %c0_i32, %c0_i32_0 : i32, i32
  }
  func.func @transform_2(%arg0: i32) -> (i32, i32) {
    %c0_i32 = arith.constant 0 : i32
    %c0_i32_0 = arith.constant 0 : i32
    %c0_i32_1 = arith.constant 0 : i32
    return %c0_i32, %c0_i32_0 : i32, i32
  }
  func.func @transform_3(%arg0: i32) -> (i32, i32) {
    %c0_i32 = arith.constant 0 : i32
    %c0_i32_0 = arith.constant 0 : i32
    return %arg0, %c0_i32 : i32, i32
  }
}

</mosaic_0001>

<bundles_post_ra>
// kernel: tpu_custom_call.1
= control target key start
LH: loop header
LB: loop body
LE: loop exit
PB: predicated region body
PF: predicated region fallthrough
CT: control target
= control target key end

     0   :  { %v936_v0 = vmov 0.0   ;;  %vm937_vm0 = vmmov 0   ;;  %vm210_vm1 = vcmask 261120   ;;  %vm665_vm2 = vcmask 523264   ;;  %s1368_s1 = inlined_call_operand.vmem [shape: bf16[32,64], index: 1, kind: input, shape index: {}]   ;;  %s1369_s0 = inlined_call_operand.vmem [shape: bf16[392,32], index: 0, kind: input, shape index: {}]   ;;  %s1370_s2 = inlined_call_operand.vmem [shape: f32[1,64], index: 2, kind: input, shape index: {}]   ;;  %s1371_s3 = inlined_call_operand.vmem [shape: f32[392,64], index: 3, kind: output, shape index: {}]  }
   0x1   :  { %799 = vmatprep.subr.bf16.mxu0 %v936_v0  ;;  %v909_v1 = vld [vmem:[%s1368_s1 + $0x8] sm:$0xff]   ;;  %903 = vmatprep.subr.bf16.mxu1 %v936_v0  ;;  %v910_v2 = vld [vmem:[%s1368_s1] sm:$0xff]   ;;  %v914_v6 = vld [vmem:[%s1369_s0 + $0x70] sm:$0xff]  }
   0x2   :  { %803 = vmatprep.mubr.msk.bf16.mxu0 %vm937_vm0, %v936_v0  ;;  %855 = vmatprep.mubr.msk.bf16.mxu1 %vm937_vm0, %v936_v0  ;;  %v911_v3 = vld [vmem:[%s1369_s0] sm:$0xff]   ;;  %v912_v4 = vld [vmem:[%s1369_s0 + $0x68] sm:$0xff]   ;;  %v915_v7 = vld [vmem:[%s1369_s0 + $0x10] sm:$0xff]  }
   0x3   :  { %800 = vmatpush3.bf16.msra.mxu0 %v909_v1  ;;  %905 = vmatpush3.bf16.msra.mxu1 %v909_v1  ;;  %v913_v5 = vld [vmem:[%s1369_s0 + $0x8] sm:$0xff]   ;;  %v916_v8 = vld [vmem:[%s1369_s0 + $0x78] sm:$0xff]   ;;  %v918_v10 = vld [vmem:[%s1369_s0 + $0x80] sm:$0xff]  }
   0x4   :  { %801 = vmatprep.subr.bf16.mxu0 %v936_v0  ;;  %904 = vmatprep.subr.bf16.mxu1 %v936_v0  ;;  %v917_v9 = vld [vmem:[%s1369_s0 + $0x18] sm:$0xff]   ;;  %v919_v11 = vld [vmem:[%s1369_s0 + $0x20] sm:$0xff]   ;;  %v920_v12 = vld [vmem:[%s1369_s0 + $0x88] sm:$0xff]  }
   0x5   :  { %v921_v13 = vld [vmem:[%s1369_s0 + $0x28] sm:$0xff]   ;;  %v922_v14 = vld [vmem:[%s1369_s0 + $0x90] sm:$0xff]   ;;  %v924_v16 = vld [vmem:[%s1369_s0 + $0x98] sm:$0xff]  }
   0x6   :  { %v923_v15 = vld [vmem:[%s1369_s0 + $0x30] sm:$0xff]   ;;  %v925_v17 = vld [vmem:[%s1369_s0 + $0x38] sm:$0xff]   ;;  %v926_v18 = vld [vmem:[%s1369_s0 + $0xa0] sm:$0xff]  }
   0x7   :  { %802 = vmatpush3.bf16.msra.mxu0 %v910_v2  ;;  %906 = vmatpush3.bf16.msra.mxu1 %v910_v2  ;;  %v927_v19 = vld [vmem:[%s1369_s0 + $0x40] sm:$0xff]   ;;  %v928_v20 = vld [vmem:[%s1369_s0 + $0xa8] sm:$0xff]   ;;  %v930_v22 = vld [vmem:[%s1369_s0 + $0xb0] sm:$0xff]  }
   0x8   :  { %v929_v21 = vld [vmem:[%s1369_s0 + $0x48] sm:$0xff]   ;;  %v931_v23 = vld [vmem:[%s1369_s0 + $0x50] sm:$0xff]   ;;  %v932_v24 = vld [vmem:[%s1369_s0 + $0xb8] sm:$0xff]  }
   0x9   :  { %v933_v25 = vld [vmem:[%s1369_s0 + $0x58] sm:$0xff]   ;;  %v934_v26 = vld [vmem:[%s1369_s0 + $0xc0] ss:$0 sps:$4 sm:$0xff]  }
   0xa   :  { %804 = vmatmul.mubr.msk.bf16.vlgmr.msra.gmra.mxu0 %vm210_vm1, %v911_v3  ;;  %856 = vmatmul.mubr.msk.bf16.vlgmr.msra.gmra.mxu1 %vm210_vm1, %v912_v4  ;;  %v935_v27 = vld [vmem:[%s1369_s0 + $0x60] sm:$0xff]  }
   0xb   :  { %807 = vmatprep.mubr.msk.bf16.mxu0 %vm937_vm0, %v936_v0  ;;  %859 = vmatprep.mubr.msk.bf16.mxu1 %vm937_vm0, %v936_v0  ;;  %v1121_v28 = vld [vmem:[%s1370_s2] ss:$0 sm:$0xff] }
  0x12   :  { %808 = vmatmul.mubr.msk.bf16.gmra.mxu0 %vm210_vm1, %v913_v5  ;;  %860 = vmatmul.mubr.msk.bf16.gmra.mxu1 %vm210_vm1, %v914_v6 }
  0x13   :  { %811 = vmatprep.mubr.msk.bf16.mxu0 %vm937_vm0, %v936_v0  ;;  %863 = vmatprep.mubr.msk.bf16.mxu1 %vm937_vm0, %v936_v0 }
  0x1a   :  { %812 = vmatmul.mubr.msk.bf16.gmra.mxu0 %vm210_vm1, %v915_v7  ;;  %864 = vmatmul.mubr.msk.bf16.gmra.mxu1 %vm210_vm1, %v916_v8 }
  0x1b   :  { %815 = vmatprep.mubr.msk.bf16.mxu0 %vm937_vm0, %v936_v0  ;;  %867 = vmatprep.mubr.msk.bf16.mxu1 %vm937_vm0, %v936_v0 }
  0x22   :  { %816 = vmatmul.mubr.msk.bf16.gmra.mxu0 %vm210_vm1, %v917_v9  ;;  %868 = vmatmul.mubr.msk.bf16.gmra.mxu1 %vm210_vm1, %v918_v10 }
  0x23   :  { %819 = vmatprep.mubr.msk.bf16.mxu0 %vm937_vm0, %v936_v0  ;;  %871 = vmatprep.mubr.msk.bf16.mxu1 %vm937_vm0, %v936_v0 }
  0x2a   :  { %820 = vmatmul.mubr.msk.bf16.gmra.mxu0 %vm210_vm1, %v919_v11  ;;  %872 = vmatmul.mubr.msk.bf16.gmra.mxu1 %vm210_vm1, %v920_v12 }
  0x2b   :  { %823 = vmatprep.mubr.msk.bf16.mxu0 %vm937_vm0, %v936_v0  ;;  %875 = vmatprep.mubr.msk.bf16.mxu1 %vm937_vm0, %v936_v0 }
  0x32   :  { %824 = vmatmul.mubr.msk.bf16.gmra.mxu0 %vm210_vm1, %v921_v13  ;;  %876 = vmatmul.mubr.msk.bf16.gmra.mxu1 %vm210_vm1, %v922_v14 }
  0x33   :  { %827 = vmatprep.mubr.msk.bf16.mxu0 %vm937_vm0, %v936_v0  ;;  %879 = vmatprep.mubr.msk.bf16.mxu1 %vm937_vm0, %v936_v0 }
  0x3a   :  { %828 = vmatmul.mubr.msk.bf16.gmra.mxu0 %vm210_vm1, %v923_v15  ;;  %880 = vmatmul.mubr.msk.bf16.gmra.mxu1 %vm210_vm1, %v924_v16 }
  0x3b   :  { %831 = vmatprep.mubr.msk.bf16.mxu0 %vm937_vm0, %v936_v0  ;;  %883 = vmatprep.mubr.msk.bf16.mxu1 %vm937_vm0, %v936_v0 }
  0x42   :  { %832 = vmatmul.mubr.msk.bf16.gmra.mxu0 %vm210_vm1, %v925_v17  ;;  %884 = vmatmul.mubr.msk.bf16.gmra.mxu1 %vm210_vm1, %v926_v18 }
  0x43   :  { %835 = vmatprep.mubr.msk.bf16.mxu0 %vm937_vm0, %v936_v0  ;;  %887 = vmatprep.mubr.msk.bf16.mxu1 %vm937_vm0, %v936_v0 }
  0x4a   :  { %836 = vmatmul.mubr.msk.bf16.gmra.mxu0 %vm210_vm1, %v927_v19  ;;  %888 = vmatmul.mubr.msk.bf16.gmra.mxu1 %vm210_vm1, %v928_v20 }
  0x4b   :  { %839 = vmatprep.mubr.msk.bf16.mxu0 %vm937_vm0, %v936_v0  ;;  %891 = vmatprep.mubr.msk.bf16.mxu1 %vm937_vm0, %v936_v0 }
  0x52   :  { %840 = vmatmul.mubr.msk.bf16.gmra.mxu0 %vm210_vm1, %v929_v21  ;;  %892 = vmatmul.mubr.msk.bf16.gmra.mxu1 %vm210_vm1, %v930_v22 }
  0x53   :  { %843 = vmatprep.mubr.msk.bf16.mxu0 %vm937_vm0, %v936_v0  ;;  %895 = vmatprep.mubr.msk.bf16.mxu1 %vm937_vm0, %v936_v0 }
  0x5a   :  { %844 = vmatmul.mubr.msk.bf16.gmra.mxu0 %vm210_vm1, %v931_v23  ;;  %896 = vmatmul.mubr.msk.bf16.gmra.mxu1 %vm210_vm1, %v932_v24 }
  0x5b   :  { %847 = vmatprep.mubr.msk.bf16.mxu0 %vm937_vm0, %v936_v0  ;;  %899 = vmatprep.mubr.msk.bf16.mxu1 %vm937_vm0, %v936_v0 }
  0x62   :  { %848 = vmatmul.mubr.msk.bf16.gmra.mxu0 %vm210_vm1, %v933_v25  ;;  %900 = vmatmul.mubr.msk.bf16.gmra.mxu1 %vm210_vm1, %v934_v26 }
  0x63   :  { %851 = vmatprep.mubr.msk.bf16.mxu0 %vm937_vm0, %v936_v0 }
  0x6a   :  { %852 = vmatmul.mubr.msk.bf16.gmra.mxu0 %vm210_vm1, %v935_v27 }
  0xca   :  { %v320_v29 = vpop.f32.mrf.mxu0  ;;  %v424_v30 = vpop.f32.mrf.mxu1 }
  0xcb   :  { %v321_v31 = vadd.f32 %v1121_v28, %v320_v29  ;;  %v425_v32 = vadd.f32 %v1121_v28, %v424_v30 }
  0xcc   :  { %v805_v33 = vpop.f32.mrf.mxu0  ;;  %v857_v34 = vpop.f32.mrf.mxu1 }
  0xcd   :  { %vm518_vm3 = vcmp.gt.f32.partialorder %v321_v31, 0.0  ;;  %v567_v35 = vmul.f32 0.2, %v321_v31  ;;  %vm544_vm4 = vcmp.gt.f32.partialorder %v425_v32, 0.0  ;;  %v593_v36 = vmul.f32 0.2, %v425_v32 }
  0xce   :  { %v323_v37 = vpop.f32.mrf.mxu0  ;;  %v427_v38 = vpop.f32.mrf.mxu1 }
  0xcf   :  { %v616_v39 = vsel %vm518_vm3, %v321_v31, %v567_v35  ;;  %v324_v40 = vadd.f32 %v1121_v28, %v323_v37  ;;  %v642_v41 = vsel %vm544_vm4, %v425_v32, %v593_v36  ;;  %v428_v42 = vadd.f32 %v1121_v28, %v427_v38 }
  0xd0   :  { %666 = vst.msk [vmem:[%s1371_s3] sm:$0xff] %vm665_vm2, %v616_v39  ;;  %v806_v43 = vpop.f32.mrf.mxu0  ;;  %692 = vst.msk [vmem:[%s1371_s3 + $0xd0] sm:$0xff] %vm665_vm2, %v642_v41  ;;  %v858_v44 = vpop.f32.mrf.mxu1 }
  0xd1   :  { %vm519_vm5 = vcmp.gt.f32.partialorder %v324_v40, 0.0  ;;  %v568_v45 = vmul.f32 0.2, %v324_v40  ;;  %vm545_vm6 = vcmp.gt.f32.partialorder %v428_v42, 0.0  ;;  %v594_v46 = vmul.f32 0.2, %v428_v42 }
  0xd2   :  { %v328_v47 = vpop.f32.mrf.mxu0  ;;  %v432_v48 = vpop.f32.mrf.mxu1 }
  0xd3   :  { %v617_v49 = vsel %vm519_vm5, %v324_v40, %v568_v45  ;;  %v329_v50 = vadd.f32 %v1121_v28, %v328_v47  ;;  %v643_v51 = vsel %vm545_vm6, %v428_v42, %v594_v46  ;;  %v433_v52 = vadd.f32 %v1121_v28, %v432_v48 }
  0xd4   :  { %667 = vst.msk [vmem:[%s1371_s3 + $0x8] sm:$0xff] %vm665_vm2, %v617_v49  ;;  %v809_v53 = vpop.f32.mrf.mxu0  ;;  %693 = vst.msk [vmem:[%s1371_s3 + $0xd8] sm:$0xff] %vm665_vm2, %v643_v51  ;;  %v861_v54 = vpop.f32.mrf.mxu1 }
  0xd5   :  { %vm520_vm7 = vcmp.gt.f32.partialorder %v329_v50, 0.0  ;;  %v569_v55 = vmul.f32 0.2, %v329_v50  ;;  %vm546_vm8 = vcmp.gt.f32.partialorder %v433_v52, 0.0  ;;  %v595_v56 = vmul.f32 0.2, %v433_v52 }
  0xd6   :  { %v331_v57 = vpop.f32.mrf.mxu0  ;;  %v435_v58 = vpop.f32.mrf.mxu1 }
  0xd7   :  { %v618_v59 = vsel %vm520_vm7, %v329_v50, %v569_v55  ;;  %v332_v60 = vadd.f32 %v1121_v28, %v331_v57  ;;  %v644_v61 = vsel %vm546_vm8, %v433_v52, %v595_v56  ;;  %v436_v62 = vadd.f32 %v1121_v28, %v435_v58 }
  0xd8   :  { %668 = vst.msk [vmem:[%s1371_s3 + $0x10] sm:$0xff] %vm665_vm2, %v618_v59  ;;  %v810_v63 = vpop.f32.mrf.mxu0  ;;  %694 = vst.msk [vmem:[%s1371_s3 + $0xe0] sm:$0xff] %vm665_vm2, %v644_v61  ;;  %v862_v0 = vpop.f32.mrf.mxu1 }
  0xd9   :  { %vm521_vm9 = vcmp.gt.f32.partialorder %v332_v60, 0.0  ;;  %v570_v1 = vmul.f32 0.2, %v332_v60  ;;  %vm547_vm10 = vcmp.gt.f32.partialorder %v436_v62, 0.0  ;;  %v596_v2 = vmul.f32 0.2, %v436_v62 }
  0xda   :  { %v336_v3 = vpop.f32.mrf.mxu0  ;;  %v440_v4 = vpop.f32.mrf.mxu1 }
  0xdb   :  { %v619_v5 = vsel %vm521_vm9, %v332_v60, %v570_v1  ;;  %v337_v6 = vadd.f32 %v1121_v28, %v336_v3  ;;  %v645_v7 = vsel %vm547_vm10, %v436_v62, %v596_v2  ;;  %v441_v8 = vadd.f32 %v1121_v28, %v440_v4 }
  0xdc   :  { %669 = vst.msk [vmem:[%s1371_s3 + $0x18] sm:$0xff] %vm665_vm2, %v619_v5  ;;  %v813_v9 = vpop.f32.mrf.mxu0  ;;  %695 = vst.msk [vmem:[%s1371_s3 + $0xe8] sm:$0xff] %vm665_vm2, %v645_v7  ;;  %v865_v10 = vpop.f32.mrf.mxu1 }
  0xdd   :  { %vm522_vm11 = vcmp.gt.f32.partialorder %v337_v6, 0.0  ;;  %v571_v11 = vmul.f32 0.2, %v337_v6  ;;  %vm548_vm12 = vcmp.gt.f32.partialorder %v441_v8, 0.0  ;;  %v597_v12 = vmul.f32 0.2, %v441_v8 }
  0xde   :  { %v339_v13 = vpop.f32.mrf.mxu0  ;;  %v443_v14 = vpop.f32.mrf.mxu1 }
  0xdf   :  { %v620_v15 = vsel %vm522_vm11, %v337_v6, %v571_v11  ;;  %v340_v16 = vadd.f32 %v1121_v28, %v339_v13  ;;  %v646_v17 = vsel %vm548_vm12, %v441_v8, %v597_v12  ;;  %v444_v18 = vadd.f32 %v1121_v28, %v443_v14 }
  0xe0   :  { %670 = vst.msk [vmem:[%s1371_s3 + $0x20] sm:$0xff] %vm665_vm2, %v620_v15  ;;  %v814_v19 = vpop.f32.mrf.mxu0  ;;  %696 = vst.msk [vmem:[%s1371_s3 + $0xf0] sm:$0xff] %vm665_vm2, %v646_v17  ;;  %v866_v20 = vpop.f32.mrf.mxu1 }
  0xe1   :  { %vm523_vm13 = vcmp.gt.f32.partialorder %v340_v16, 0.0  ;;  %v572_v21 = vmul.f32 0.2, %v340_v16  ;;  %vm549_vm14 = vcmp.gt.f32.partialorder %v444_v18, 0.0  ;;  %v598_v22 = vmul.f32 0.2, %v444_v18 }
  0xe2   :  { %v344_v23 = vpop.f32.mrf.mxu0  ;;  %v448_v24 = vpop.f32.mrf.mxu1 }
  0xe3   :  { %v621_v25 = vsel %vm523_vm13, %v340_v16, %v572_v21  ;;  %v345_v26 = vadd.f32 %v1121_v28, %v344_v23  ;;  %v647_v27 = vsel %vm549_vm14, %v444_v18, %v598_v22  ;;  %v449_v29 = vadd.f32 %v1121_v28, %v448_v24 }
  0xe4   :  { %671 = vst.msk [vmem:[%s1371_s3 + $0x28] sm:$0xff] %vm665_vm2, %v621_v25  ;;  %v817_v30 = vpop.f32.mrf.mxu0  ;;  %697 = vst.msk [vmem:[%s1371_s3 + $0xf8] sm:$0xff] %vm665_vm2, %v647_v27  ;;  %v869_v31 = vpop.f32.mrf.mxu1 }
  0xe5   :  { %vm524_vm15 = vcmp.gt.f32.partialorder %v345_v26, 0.0  ;;  %v573_v32 = vmul.f32 0.2, %v345_v26  ;;  %vm550_vm0 = vcmp.gt.f32.partialorder %v449_v29, 0.0  ;;  %v599_v33 = vmul.f32 0.2, %v449_v29 }
  0xe6   :  { %v347_v34 = vpop.f32.mrf.mxu0  ;;  %v451_v35 = vpop.f32.mrf.mxu1 }
  0xe7   :  { %v622_v36 = vsel %vm524_vm15, %v345_v26, %v573_v32  ;;  %v348_v37 = vadd.f32 %v1121_v28, %v347_v34  ;;  %v648_v38 = vsel %vm550_vm0, %v449_v29, %v599_v33  ;;  %v452_v39 = vadd.f32 %v1121_v28, %v451_v35 }
  0xe8   :  { %672 = vst.msk [vmem:[%s1371_s3 + $0x30] sm:$0xff] %vm665_vm2, %v622_v36  ;;  %v818_v40 = vpop.f32.mrf.mxu0  ;;  %698 = vst.msk [vmem:[%s1371_s3 + $0x100] sm:$0xff] %vm665_vm2, %v648_v38  ;;  %v870_v41 = vpop.f32.mrf.mxu1 }
  0xe9   :  { %vm525_vm1 = vcmp.gt.f32.partialorder %v348_v37, 0.0  ;;  %v574_v42 = vmul.f32 0.2, %v348_v37  ;;  %vm551_vm3 = vcmp.gt.f32.partialorder %v452_v39, 0.0  ;;  %v600_v43 = vmul.f32 0.2, %v452_v39 }
  0xea   :  { %v352_v44 = vpop.f32.mrf.mxu0  ;;  %v456_v45 = vpop.f32.mrf.mxu1 }
  0xeb   :  { %v623_v46 = vsel %vm525_vm1, %v348_v37, %v574_v42  ;;  %v353_v47 = vadd.f32 %v1121_v28, %v352_v44  ;;  %v649_v48 = vsel %vm551_vm3, %v452_v39, %v600_v43  ;;  %v457_v49 = vadd.f32 %v1121_v28, %v456_v45 }
  0xec   :  { %673 = vst.msk [vmem:[%s1371_s3 + $0x38] sm:$0xff] %vm665_vm2, %v623_v46  ;;  %v821_v50 = vpop.f32.mrf.mxu0  ;;  %699 = vst.msk [vmem:[%s1371_s3 + $0x108] sm:$0xff] %vm665_vm2, %v649_v48  ;;  %v873_v51 = vpop.f32.mrf.mxu1 }
  0xed   :  { %vm526_vm4 = vcmp.gt.f32.partialorder %v353_v47, 0.0  ;;  %v575_v52 = vmul.f32 0.2, %v353_v47  ;;  %vm552_vm5 = vcmp.gt.f32.partialorder %v457_v49, 0.0  ;;  %v601_v53 = vmul.f32 0.2, %v457_v49 }
  0xee   :  { %v355_v54 = vpop.f32.mrf.mxu0  ;;  %v459_v55 = vpop.f32.mrf.mxu1 }
  0xef   :  { %v624_v56 = vsel %vm526_vm4, %v353_v47, %v575_v52  ;;  %v356_v57 = vadd.f32 %v1121_v28, %v355_v54  ;;  %v650_v58 = vsel %vm552_vm5, %v457_v49, %v601_v53  ;;  %v460_v59 = vadd.f32 %v1121_v28, %v459_v55 }
  0xf0   :  { %674 = vst.msk [vmem:[%s1371_s3 + $0x40] sm:$0xff] %vm665_vm2, %v624_v56  ;;  %v822_v60 = vpop.f32.mrf.mxu0  ;;  %700 = vst.msk [vmem:[%s1371_s3 + $0x110] sm:$0xff] %vm665_vm2, %v650_v58  ;;  %v874_v61 = vpop.f32.mrf.mxu1 }
  0xf1   :  { %vm527_vm6 = vcmp.gt.f32.partialorder %v356_v57, 0.0  ;;  %v576_v62 = vmul.f32 0.2, %v356_v57  ;;  %vm553_vm7 = vcmp.gt.f32.partialorder %v460_v59, 0.0  ;;  %v602_v63 = vmul.f32 0.2, %v460_v59 }
  0xf2   :  { %v360_v0 = vpop.f32.mrf.mxu0  ;;  %v464_v1 = vpop.f32.mrf.mxu1 }
  0xf3   :  { %v625_v2 = vsel %vm527_vm6, %v356_v57, %v576_v62  ;;  %v361_v3 = vadd.f32 %v1121_v28, %v360_v0  ;;  %v651_v4 = vsel %vm553_vm7, %v460_v59, %v602_v63  ;;  %v465_v5 = vadd.f32 %v1121_v28, %v464_v1 }
  0xf4   :  { %675 = vst.msk [vmem:[%s1371_s3 + $0x48] sm:$0xff] %vm665_vm2, %v625_v2  ;;  %v825_v6 = vpop.f32.mrf.mxu0  ;;  %701 = vst.msk [vmem:[%s1371_s3 + $0x118] sm:$0xff] %vm665_vm2, %v651_v4  ;;  %v877_v7 = vpop.f32.mrf.mxu1 }
  0xf5   :  { %vm528_vm8 = vcmp.gt.f32.partialorder %v361_v3, 0.0  ;;  %v577_v8 = vmul.f32 0.2, %v361_v3  ;;  %vm554_vm9 = vcmp.gt.f32.partialorder %v465_v5, 0.0  ;;  %v603_v9 = vmul.f32 0.2, %v465_v5 }
  0xf6   :  { %v363_v10 = vpop.f32.mrf.mxu0  ;;  %v467_v11 = vpop.f32.mrf.mxu1 }
  0xf7   :  { %v626_v12 = vsel %vm528_vm8, %v361_v3, %v577_v8  ;;  %v364_v13 = vadd.f32 %v1121_v28, %v363_v10  ;;  %v652_v14 = vsel %vm554_vm9, %v465_v5, %v603_v9  ;;  %v468_v15 = vadd.f32 %v1121_v28, %v467_v11 }
  0xf8   :  { %676 = vst.msk [vmem:[%s1371_s3 + $0x50] sm:$0xff] %vm665_vm2, %v626_v12  ;;  %v826_v16 = vpop.f32.mrf.mxu0  ;;  %702 = vst.msk [vmem:[%s1371_s3 + $0x120] sm:$0xff] %vm665_vm2, %v652_v14  ;;  %v878_v17 = vpop.f32.mrf.mxu1 }
  0xf9   :  { %vm529_vm10 = vcmp.gt.f32.partialorder %v364_v13, 0.0  ;;  %v578_v18 = vmul.f32 0.2, %v364_v13  ;;  %vm555_vm11 = vcmp.gt.f32.partialorder %v468_v15, 0.0  ;;  %v604_v19 = vmul.f32 0.2, %v468_v15 }
  0xfa   :  { %v368_v20 = vpop.f32.mrf.mxu0  ;;  %v472_v21 = vpop.f32.mrf.mxu1 }
  0xfb   :  { %v627_v22 = vsel %vm529_vm10, %v364_v13, %v578_v18  ;;  %v369_v23 = vadd.f32 %v1121_v28, %v368_v20  ;;  %v653_v24 = vsel %vm555_vm11, %v468_v15, %v604_v19  ;;  %v473_v25 = vadd.f32 %v1121_v28, %v472_v21 }
  0xfc   :  { %677 = vst.msk [vmem:[%s1371_s3 + $0x58] sm:$0xff] %vm665_vm2, %v627_v22  ;;  %v829_v26 = vpop.f32.mrf.mxu0  ;;  %703 = vst.msk [vmem:[%s1371_s3 + $0x128] sm:$0xff] %vm665_vm2, %v653_v24  ;;  %v881_v27 = vpop.f32.mrf.mxu1 }
  0xfd   :  { %vm530_vm12 = vcmp.gt.f32.partialorder %v369_v23, 0.0  ;;  %v579_v29 = vmul.f32 0.2, %v369_v23  ;;  %vm556_vm13 = vcmp.gt.f32.partialorder %v473_v25, 0.0  ;;  %v605_v30 = vmul.f32 0.2, %v473_v25 }
  0xfe   :  { %v371_v31 = vpop.f32.mrf.mxu0  ;;  %v475_v32 = vpop.f32.mrf.mxu1 }
  0xff   :  { %v628_v33 = vsel %vm530_vm12, %v369_v23, %v579_v29  ;;  %v372_v34 = vadd.f32 %v1121_v28, %v371_v31  ;;  %v654_v35 = vsel %vm556_vm13, %v473_v25, %v605_v30  ;;  %v476_v36 = vadd.f32 %v1121_v28, %v475_v32 }
 0x100   :  { %678 = vst.msk [vmem:[%s1371_s3 + $0x60] sm:$0xff] %vm665_vm2, %v628_v33  ;;  %v830_v37 = vpop.f32.mrf.mxu0  ;;  %704 = vst.msk [vmem:[%s1371_s3 + $0x130] sm:$0xff] %vm665_vm2, %v654_v35  ;;  %v882_v38 = vpop.f32.mrf.mxu1 }
 0x101   :  { %vm531_vm14 = vcmp.gt.f32.partialorder %v372_v34, 0.0  ;;  %v580_v39 = vmul.f32 0.2, %v372_v34  ;;  %vm557_vm15 = vcmp.gt.f32.partialorder %v476_v36, 0.0  ;;  %v606_v40 = vmul.f32 0.2, %v476_v36 }
 0x102   :  { %v376_v41 = vpop.f32.mrf.mxu0  ;;  %v480_v42 = vpop.f32.mrf.mxu1 }
 0x103   :  { %v629_v43 = vsel %vm531_vm14, %v372_v34, %v580_v39  ;;  %v377_v44 = vadd.f32 %v1121_v28, %v376_v41  ;;  %v655_v45 = vsel %vm557_vm15, %v476_v36, %v606_v40  ;;  %v481_v46 = vadd.f32 %v1121_v28, %v480_v42 }
 0x104   :  { %679 = vst.msk [vmem:[%s1371_s3 + $0x68] sm:$0xff] %vm665_vm2, %v629_v43  ;;  %v833_v47 = vpop.f32.mrf.mxu0  ;;  %705 = vst.msk [vmem:[%s1371_s3 + $0x138] sm:$0xff] %vm665_vm2, %v655_v45  ;;  %v885_v48 = vpop.f32.mrf.mxu1 }
 0x105   :  { %vm532_vm0 = vcmp.gt.f32.partialorder %v377_v44, 0.0  ;;  %v581_v49 = vmul.f32 0.2, %v377_v44  ;;  %vm558_vm1 = vcmp.gt.f32.partialorder %v481_v46, 0.0  ;;  %v607_v50 = vmul.f32 0.2, %v481_v46 }
 0x106   :  { %v379_v51 = vpop.f32.mrf.mxu0  ;;  %v483_v52 = vpop.f32.mrf.mxu1 }
 0x107   :  { %v630_v53 = vsel %vm532_vm0, %v377_v44, %v581_v49  ;;  %v380_v54 = vadd.f32 %v1121_v28, %v379_v51  ;;  %v656_v55 = vsel %vm558_vm1, %v481_v46, %v607_v50  ;;  %v484_v56 = vadd.f32 %v1121_v28, %v483_v52 }
 0x108   :  { %680 = vst.msk [vmem:[%s1371_s3 + $0x70] sm:$0xff] %vm665_vm2, %v630_v53  ;;  %v834_v57 = vpop.f32.mrf.mxu0  ;;  %706 = vst.msk [vmem:[%s1371_s3 + $0x140] sm:$0xff] %vm665_vm2, %v656_v55  ;;  %v886_v58 = vpop.f32.mrf.mxu1 }
 0x109   :  { %vm533_vm3 = vcmp.gt.f32.partialorder %v380_v54, 0.0  ;;  %v582_v59 = vmul.f32 0.2, %v380_v54  ;;  %vm559_vm4 = vcmp.gt.f32.partialorder %v484_v56, 0.0  ;;  %v608_v60 = vmul.f32 0.2, %v484_v56 }
 0x10a   :  { %v384_v61 = vpop.f32.mrf.mxu0  ;;  %v488_v62 = vpop.f32.mrf.mxu1 }
 0x10b   :  { %v631_v63 = vsel %vm533_vm3, %v380_v54, %v582_v59  ;;  %v385_v0 = vadd.f32 %v1121_v28, %v384_v61  ;;  %v657_v1 = vsel %vm559_vm4, %v484_v56, %v608_v60  ;;  %v489_v2 = vadd.f32 %v1121_v28, %v488_v62 }
 0x10c   :  { %681 = vst.msk [vmem:[%s1371_s3 + $0x78] sm:$0xff] %vm665_vm2, %v631_v63  ;;  %v837_v3 = vpop.f32.mrf.mxu0  ;;  %707 = vst.msk [vmem:[%s1371_s3 + $0x148] sm:$0xff] %vm665_vm2, %v657_v1  ;;  %v889_v4 = vpop.f32.mrf.mxu1 }
 0x10d   :  { %vm534_vm5 = vcmp.gt.f32.partialorder %v385_v0, 0.0  ;;  %v583_v5 = vmul.f32 0.2, %v385_v0  ;;  %vm560_vm6 = vcmp.gt.f32.partialorder %v489_v2, 0.0  ;;  %v609_v6 = vmul.f32 0.2, %v489_v2 }
 0x10e   :  { %v387_v7 = vpop.f32.mrf.mxu0  ;;  %v491_v8 = vpop.f32.mrf.mxu1 }
 0x10f   :  { %v632_v9 = vsel %vm534_vm5, %v385_v0, %v583_v5  ;;  %v388_v10 = vadd.f32 %v1121_v28, %v387_v7  ;;  %v658_v11 = vsel %vm560_vm6, %v489_v2, %v609_v6  ;;  %v492_v12 = vadd.f32 %v1121_v28, %v491_v8 }
 0x110   :  { %682 = vst.msk [vmem:[%s1371_s3 + $0x80] sm:$0xff] %vm665_vm2, %v632_v9  ;;  %v838_v13 = vpop.f32.mrf.mxu0  ;;  %708 = vst.msk [vmem:[%s1371_s3 + $0x150] sm:$0xff] %vm665_vm2, %v658_v11  ;;  %v890_v14 = vpop.f32.mrf.mxu1 }
 0x111   :  { %vm535_vm7 = vcmp.gt.f32.partialorder %v388_v10, 0.0  ;;  %v584_v15 = vmul.f32 0.2, %v388_v10  ;;  %vm561_vm8 = vcmp.gt.f32.partialorder %v492_v12, 0.0  ;;  %v610_v16 = vmul.f32 0.2, %v492_v12 }
 0x112   :  { %v392_v17 = vpop.f32.mrf.mxu0  ;;  %v496_v18 = vpop.f32.mrf.mxu1 }
 0x113   :  { %v633_v19 = vsel %vm535_vm7, %v388_v10, %v584_v15  ;;  %v393_v20 = vadd.f32 %v1121_v28, %v392_v17  ;;  %v659_v21 = vsel %vm561_vm8, %v492_v12, %v610_v16  ;;  %v497_v22 = vadd.f32 %v1121_v28, %v496_v18 }
 0x114   :  { %683 = vst.msk [vmem:[%s1371_s3 + $0x88] sm:$0xff] %vm665_vm2, %v633_v19  ;;  %v841_v23 = vpop.f32.mrf.mxu0  ;;  %709 = vst.msk [vmem:[%s1371_s3 + $0x158] sm:$0xff] %vm665_vm2, %v659_v21  ;;  %v893_v24 = vpop.f32.mrf.mxu1 }
 0x115   :  { %vm536_vm9 = vcmp.gt.f32.partialorder %v393_v20, 0.0  ;;  %v585_v25 = vmul.f32 0.2, %v393_v20  ;;  %vm562_vm10 = vcmp.gt.f32.partialorder %v497_v22, 0.0  ;;  %v611_v26 = vmul.f32 0.2, %v497_v22 }
 0x116   :  { %v395_v27 = vpop.f32.mrf.mxu0  ;;  %v499_v29 = vpop.f32.mrf.mxu1 }
 0x117   :  { %v634_v30 = vsel %vm536_vm9, %v393_v20, %v585_v25  ;;  %v396_v31 = vadd.f32 %v1121_v28, %v395_v27  ;;  %v660_v32 = vsel %vm562_vm10, %v497_v22, %v611_v26  ;;  %v500_v33 = vadd.f32 %v1121_v28, %v499_v29 }
 0x118   :  { %684 = vst.msk [vmem:[%s1371_s3 + $0x90] sm:$0xff] %vm665_vm2, %v634_v30  ;;  %v842_v34 = vpop.f32.mrf.mxu0  ;;  %710 = vst.msk [vmem:[%s1371_s3 + $0x160] sm:$0xff] %vm665_vm2, %v660_v32  ;;  %v894_v35 = vpop.f32.mrf.mxu1 }
 0x119   :  { %vm537_vm11 = vcmp.gt.f32.partialorder %v396_v31, 0.0  ;;  %v586_v36 = vmul.f32 0.2, %v396_v31  ;;  %vm563_vm12 = vcmp.gt.f32.partialorder %v500_v33, 0.0  ;;  %v612_v37 = vmul.f32 0.2, %v500_v33 }
 0x11a   :  { %v400_v38 = vpop.f32.mrf.mxu0  ;;  %v504_v39 = vpop.f32.mrf.mxu1 }
 0x11b   :  { %v635_v40 = vsel %vm537_vm11, %v396_v31, %v586_v36  ;;  %v401_v41 = vadd.f32 %v1121_v28, %v400_v38  ;;  %v661_v42 = vsel %vm563_vm12, %v500_v33, %v612_v37  ;;  %v505_v43 = vadd.f32 %v1121_v28, %v504_v39 }
 0x11c   :  { %685 = vst.msk [vmem:[%s1371_s3 + $0x98] sm:$0xff] %vm665_vm2, %v635_v40  ;;  %v845_v44 = vpop.f32.mrf.mxu0  ;;  %711 = vst.msk [vmem:[%s1371_s3 + $0x168] sm:$0xff] %vm665_vm2, %v661_v42  ;;  %v897_v45 = vpop.f32.mrf.mxu1 }
 0x11d   :  { %vm538_vm13 = vcmp.gt.f32.partialorder %v401_v41, 0.0  ;;  %v587_v46 = vmul.f32 0.2, %v401_v41  ;;  %vm564_vm14 = vcmp.gt.f32.partialorder %v505_v43, 0.0  ;;  %v613_v47 = vmul.f32 0.2, %v505_v43 }
 0x11e   :  { %v403_v48 = vpop.f32.mrf.mxu0  ;;  %v507_v49 = vpop.f32.mrf.mxu1 }
 0x11f   :  { %v636_v50 = vsel %vm538_vm13, %v401_v41, %v587_v46  ;;  %v404_v51 = vadd.f32 %v1121_v28, %v403_v48  ;;  %v662_v52 = vsel %vm564_vm14, %v505_v43, %v613_v47  ;;  %v508_v53 = vadd.f32 %v1121_v28, %v507_v49 }
 0x120   :  { %686 = vst.msk [vmem:[%s1371_s3 + $0xa0] sm:$0xff] %vm665_vm2, %v636_v50  ;;  %v846_v54 = vpop.f32.mrf.mxu0  ;;  %712 = vst.msk [vmem:[%s1371_s3 + $0x170] sm:$0xff] %vm665_vm2, %v662_v52  ;;  %v898_v55 = vpop.f32.mrf.mxu1 }
 0x121   :  { %vm539_vm15 = vcmp.gt.f32.partialorder %v404_v51, 0.0  ;;  %v588_v56 = vmul.f32 0.2, %v404_v51  ;;  %vm565_vm0 = vcmp.gt.f32.partialorder %v508_v53, 0.0  ;;  %v614_v57 = vmul.f32 0.2, %v508_v53 }
 0x122   :  { %v408_v58 = vpop.f32.mrf.mxu0  ;;  %v512_v59 = vpop.f32.mrf.mxu1 }
 0x123   :  { %v637_v60 = vsel %vm539_vm15, %v404_v51, %v588_v56  ;;  %v409_v61 = vadd.f32 %v1121_v28, %v408_v58  ;;  %v663_v62 = vsel %vm565_vm0, %v508_v53, %v614_v57  ;;  %v513_v63 = vadd.f32 %v1121_v28, %v512_v59 }
 0x124   :  { %687 = vst.msk [vmem:[%s1371_s3 + $0xa8] sm:$0xff] %vm665_vm2, %v637_v60  ;;  %v849_v0 = vpop.f32.mrf.mxu0  ;;  %713 = vst.msk [vmem:[%s1371_s3 + $0x178] sm:$0xff] %vm665_vm2, %v663_v62  ;;  %v901_v1 = vpop.f32.mrf.mxu1 }
 0x125   :  { %vm540_vm1 = vcmp.gt.f32.partialorder %v409_v61, 0.0  ;;  %v589_v2 = vmul.f32 0.2, %v409_v61  ;;  %vm566_vm3 = vcmp.gt.f32.partialorder %v513_v63, 0.0  ;;  %v615_v3 = vmul.f32 0.2, %v513_v63 }
 0x126   :  { %v411_v4 = vpop.f32.mrf.mxu0  ;;  %v515_v5 = vpop.f32.mrf.mxu1 }
 0x127   :  { %v638_v6 = vsel %vm540_vm1, %v409_v61, %v589_v2  ;;  %v412_v7 = vadd.f32 %v1121_v28, %v411_v4  ;;  %v664_v8 = vsel %vm566_vm3, %v513_v63, %v615_v3 }
 0x128   :  { %688 = vst.msk [vmem:[%s1371_s3 + $0xb0] sm:$0xff] %vm665_vm2, %v638_v6  ;;  %v850_v9 = vpop.f32.mrf.mxu0  ;;  %714 = vst.msk [vmem:[%s1371_s3 + $0x180] sm:$0xff] %vm665_vm2, %v664_v8  ;;  %v902_v10 = vpop.f32.mrf.mxu1 }
 0x129   :  { %vm541_vm4 = vcmp.gt.f32.partialorder %v412_v7, 0.0  ;;  %v590_v11 = vmul.f32 0.2, %v412_v7 }
 0x12a   :  { %v416_v12 = vpop.f32.mrf.mxu0 }
 0x12b   :  { %v639_v13 = vsel %vm541_vm4, %v412_v7, %v590_v11  ;;  %v417_v14 = vadd.f32 %v1121_v28, %v416_v12 }
 0x12c   :  { %689 = vst.msk [vmem:[%s1371_s3 + $0xb8] sm:$0xff] %vm665_vm2, %v639_v13  ;;  %v853_v15 = vpop.f32.mrf.mxu0 }
 0x12d   :  { %vm542_vm5 = vcmp.gt.f32.partialorder %v417_v14, 0.0  ;;  %v591_v16 = vmul.f32 0.2, %v417_v14 }
 0x12e   :  { %v419_v17 = vpop.f32.mrf.mxu0 }
 0x12f   :  { %v640_v18 = vsel %vm542_vm5, %v417_v14, %v591_v16  ;;  %v420_v19 = vadd.f32 %v1121_v28, %v419_v17 }
 0x130   :  { %690 = vst.msk [vmem:[%s1371_s3 + $0xc0] sm:$0xff] %vm665_vm2, %v640_v18  ;;  %v854_v20 = vpop.f32.mrf.mxu0 }
 0x131   :  { %vm543_vm6 = vcmp.gt.f32.partialorder %v420_v19, 0.0  ;;  %v592_v21 = vmul.f32 0.2, %v420_v19 }
 0x133   :  { %v641_v22 = vsel %vm543_vm6, %v420_v19, %v592_v21 }
 0x134   :  { %691 = vst.msk [vmem:[%s1371_s3 + $0xc8] sm:$0xff] %vm665_vm2, %v641_v22 }

</bundles_post_ra>
